<compile_context>
chip_gen: v7x
topology: tpu7x:2x2x1
jax: 0.10.0
libtpu: 0.0.40
codegen_flags: <defaults>
</compile_context>

<pallas_src>
import functools

import jax
import jax.numpy as jnp
from jax.experimental import pallas as pl
from jax.experimental.pallas import tpu as pltpu

_VMEM_LIMIT = 48 * 1024 * 1024  # < v7x 64 MiB physical, > v5e/v6e default scoped


def _round_up(x, m):
    return (x + m - 1) // m * m


# ------------------------- one-time weight preparation ----------------------
def prepare_biaffine_weight(weight, ent1_feature, ent2_feature, out_feature,
                            bias=(True, True)):
    """Rearranges the nn.Linear weight [O*(D2+b1), D1+b0] into kernel layout.

    Returns (wt_all, wb_all):
      wt_all : [D1, O*D2 (+ O)]  main weight with the d2-bias columns appended
      wb_all : [1,  O*D2 (+ O)]  d1-bias row (or None when bias[0] is False)
    Run once per parameter update, not per forward call.
    """
    D1, D2, O = ent1_feature, ent2_feature, out_feature
    b0, b1 = bool(bias[0]), bool(bias[1])
    D1b, D2b = D1 + int(b0), D2 + int(b1)
    assert weight.shape == (O * D2b, D1b), weight.shape

    w3 = weight.reshape(O, D2b, D1b)                       # [O, D2b, D1b]
    wt_main = jnp.transpose(w3[:, :D2, :D1].reshape(O * D2, D1))  # [D1, O*D2]
    parts_w = [wt_main]
    parts_b = [w3[:, :D2, D1].reshape(1, O * D2)] if b0 else []
    if b1:
        parts_w.append(jnp.transpose(w3[:, D2, :D1]))      # [D1, O] d2-bias cols
        if b0:
            parts_b.append(w3[:, D2, D1].reshape(1, O))
    wt_all = parts_w[0] if len(parts_w) == 1 else jnp.concatenate(parts_w, 1)
    if parts_b:
        wb_all = parts_b[0] if len(parts_b) == 1 else jnp.concatenate(parts_b, 1)
    else:
        wb_all = None
    return wt_all, wb_all


# ----------------------------- stage 1: linear ------------------------------
# acc[m, q] = sum_d e1_flat[m, d] * wt_all[d, q]  (+ d1-bias row)
#   q <  O*D2 : main affine output     (-> am_ref)
#   q >= O*D2 : ent2-bias contribution (-> ab_ref), only when bias[1]
def _stage1_kernel(e1_ref, w_ref, *rest, ncols_main, has_b0, has_b1):
    idx = 0
    wb_ref = rest[idx] if has_b0 else None
    idx += int(has_b0)
    am_ref = rest[idx]
    ab_ref = rest[idx + 1] if has_b1 else None

    acc = jnp.dot(e1_ref[...], w_ref[...],
                  preferred_element_type=jnp.float32)      # [TM, Wcols]
    if has_b0:
        acc = acc + wb_ref[...].astype(jnp.float32)        # broadcast row add
    if has_b1:
        # One matmul produced [TM, O*D2 | O]; lane-slice into the two outputs.
        am_ref[...] = acc[:, :ncols_main].astype(am_ref.dtype)
        ab_ref[...] = acc[:, ncols_main:].astype(ab_ref.dtype)
    else:
        am_ref[...] = acc.astype(am_ref.dtype)


# --------------------------- stage 2: biaffine bmm ---------------------------
# out[b, j, i*O+o] = sum_c e2[b, j, c] * a_flat[b, i*O+o, c]  (+ ent2-bias row)
def _stage2_kernel(e2_ref, a_ref, *rest, has_b1):
    if has_b1:
        ab_ref, out_ref = rest
    else:
        (out_ref,) = rest
    e2 = e2_ref[0]                                          # [L2, D2]
    a = a_ref[0]                                            # [N,  D2]
    # LHS (e2) feeds MXU rows directly and the result lands in the final
    # PyTorch layout, so the [L2, N] store is lane-dense.  Mosaic transposes
    # the [N, D2] RHS (XLU work, overlapped with MXU); if that slot ever
    # saturates at large N*D2, flip operands and transpose the small [N, L2]
    # result instead (or use a VPU multiply+reduce when L2 == 1).
    out = jax.lax.dot_general(e2, a, (((1,), (1,)), ((), ())),
                              preferred_element_type=jnp.float32)  # [L2, N]
    if has_b1:
        out = out + ab_ref[0].astype(jnp.float32)           # [1, N] broadcast
    out_ref[0] = out.astype(out_ref.dtype)


# --------------------------------- wrapper ----------------------------------
@functools.partial(jax.jit, static_argnames=("out_feature", "bias"))
def biaffine_forward(ent1, ent2, wt_all, wb_all, *, out_feature,
                     bias=(True, True)):
    """Pallas implementation of Biaffine.forward (weights pre-arranged)."""
    B, L1, D1 = ent1.shape
    B2, L2, D2 = ent2.shape
    assert B == B2
    O = out_feature
    b0, b1 = bool(bias[0]), bool(bias[1])
    ncols_main = O * D2
    wcols = ncols_main + (O if b1 else 0)
    assert wt_all.shape == (D1, wcols), wt_all.shape

    inter_dtype = ent1.dtype        # bf16 in -> bf16 intermediate (half HBM)
    isz = jnp.dtype(ent1.dtype).itemsize
    wsz = jnp.dtype(wt_all.dtype).itemsize
    xsz = jnp.dtype(inter_dtype).itemsize

    # ------------------------------ stage 1 --------------------------------
    # Flatten batch into M so each MXU pass uses full 128/256-row tiles.
    M = B * L1
    if M > 256:
        TM = 256
        Mp = _round_up(M, TM)
    else:
        TM = M                       # single full-extent tile for small M
        Mp = M
    e1_flat = ent1.reshape(M, D1)
    if Mp != M:
        e1_flat = jnp.pad(e1_flat, ((0, Mp - M), (0, 0)))
    grid_m = Mp // TM

    in_arrays = [e1_flat, wt_all]
    in_specs = [
        pl.BlockSpec((TM, D1), lambda m: (m, 0)),
        # constant index_map -> weight fetched once, resident across M tiles
        pl.BlockSpec((D1, wcols), lambda m: (0, 0)),
    ]
    if b0:
        in_arrays.append(wb_all)
        in_specs.append(pl.BlockSpec((1, wcols), lambda m: (0, 0)))

    out_shapes = [jax.ShapeDtypeStruct((Mp, ncols_main), inter_dtype)]
    out_specs = [pl.BlockSpec((TM, ncols_main), lambda m: (m, 0))]
    if b1:
        out_shapes.append(jax.ShapeDtypeStruct((Mp, O), inter_dtype))
        out_specs.append(pl.BlockSpec((TM, O), lambda m: (m, 0)))

    flops1 = 2 * Mp * D1 * wcols + (Mp * wcols if b0 else 0)
    bytes1 = (Mp * D1 * isz
              + (D1 * wcols + (wcols if b0 else 0)) * wsz
              + Mp * wcols * xsz)

    outs1 = pl.pallas_call(
        functools.partial(_stage1_kernel, ncols_main=ncols_main,
                          has_b0=b0, has_b1=b1),
        out_shape=tuple(out_shapes),
        grid=(grid_m,),
        in_specs=in_specs,
        out_specs=tuple(out_specs),
        compiler_params=pltpu.CompilerParams(
            dimension_semantics=("parallel",),
            vmem_limit_bytes=_VMEM_LIMIT),
        cost_estimate=pl.CostEstimate(
            flops=flops1, transcendentals=0, bytes_accessed=bytes1),
    )(*in_arrays)

    a_main = outs1[0]
    if Mp != M:
        a_main = a_main[:M]
    N = L1 * O
    # Contiguous reshapes (torch's .view, row index i*O + o) -- free at XLA level.
    a_flat = a_main.reshape(B, N, D2)
    if b1:
        ab = outs1[1]
        if Mp != M:
            ab = ab[:M]
        ab_flat = ab.reshape(B, 1, N)

    # ------------------------------ stage 2 --------------------------------
    in_arrays2 = [ent2, a_flat]
    in_specs2 = [
        pl.BlockSpec((1, L2, D2), lambda b: (b, 0, 0)),
        pl.BlockSpec((1, N, D2), lambda b: (b, 0, 0)),
    ]
    if b1:
        in_arrays2.append(ab_flat)
        in_specs2.append(pl.BlockSpec((1, 1, N), lambda b: (b, 0, 0)))

    flops2 = 2 * B * L2 * N * D2 + (B * L2 * N if b1 else 0)
    bytes2 = B * (L2 * D2 * isz + N * D2 * xsz
                  + (N * xsz if b1 else 0) + L2 * N * isz)

    out = pl.pallas_call(
        functools.partial(_stage2_kernel, has_b1=b1),
        out_shape=jax.ShapeDtypeStruct((B, L2, N), ent1.dtype),
        grid=(B,),
        in_specs=in_specs2,
        # final PyTorch layout [B, L2, L1*O] emitted directly; lane dim = L1*O
        out_specs=pl.BlockSpec((1, L2, N), lambda b: (b, 0, 0)),
        compiler_params=pltpu.CompilerParams(
            dimension_semantics=("parallel",),
            vmem_limit_bytes=_VMEM_LIMIT),
        cost_estimate=pl.CostEstimate(
            flops=flops2, transcendentals=0, bytes_accessed=bytes2),
    )(*in_arrays2)

    if L2 == 1:  # torch .squeeze(1) only removes dim 1 if it equals 1
        out = jnp.squeeze(out, axis=1)
    return out


# --------------------------- pure-JAX reference ------------------------------
def biaffine_reference(ent1, ent2, weight, out_feature, bias=(True, True)):
    """Mirror of the PyTorch forward (for correctness check)."""
    B, L1, D1 = ent1.shape
    _, L2, D2 = ent2.shape
    if bias[0]:
        ent1 = jnp.concatenate(
            [ent1, jnp.ones((B, L1, 1), dtype=ent1.dtype)], axis=2)
    if bias[1]:
        ent2 = jnp.concatenate(
            [ent2, jnp.ones((B, L2, 1), dtype=ent2.dtype)], axis=2)
    affine = jnp.einsum("bid,od->bio", ent1, weight)        # linear, no bias
    affine = affine.reshape(B, L1 * out_feature, -1)        # .view
    bia = jnp.einsum("bmd,bjd->bjm", affine, ent2)          # bmm + transpose
    if L2 == 1:
        bia = jnp.squeeze(bia, axis=1)
    return bia


if __name__ == "__main__":
    # Small shapes consistent with the module; L1*out_feature = 128 so the
    # stage-2 output stores are lane-dense, and O*D2 = 256 keeps the in-kernel
    # lane-slice vreg-aligned.
    B, L1, L2 = 2, 16, 16
    ent1_feature, ent2_feature, out_feature = 32, 32, 8
    bias = (True, True)

    D1b = ent1_feature + int(bias[0])                    # 33
    Wout = out_feature * (ent2_feature + int(bias[1]))   # 264

    key = jax.random.PRNGKey(0)
    k1, k2, kw = jax.random.split(key, 3)
    ent1 = jax.random.normal(k1, (B, L1, ent1_feature), dtype=jnp.float32)
    ent2 = jax.random.normal(k2, (B, L2, ent2_feature), dtype=jnp.float32)
    # Deterministic weight init (nn.Linear-style uniform bound 1/sqrt(fan_in)).
    bound = 1.0 / (D1b ** 0.5)
    weight = jax.random.uniform(
        kw, (Wout, D1b), dtype=jnp.float32, minval=-bound, maxval=bound)

    # One-time parameter prep (hoisted out of the forward).
    wt_all, wb_all = prepare_biaffine_weight(
        weight, ent1_feature, ent2_feature, out_feature, bias)
    wt_all = jax.block_until_ready(wt_all)

    out = biaffine_forward(ent1, ent2, wt_all, wb_all,
                           out_feature=out_feature, bias=bias)
    out = jax.block_until_ready(out)

    ref = biaffine_reference(ent1, ent2, weight, out_feature, bias)
    assert out.shape == (B, L2, L1 * out_feature), out.shape
    assert jnp.allclose(out, ref, atol=1e-4, rtol=1e-4), "mismatch vs reference"

    print("KERNEL_OK")
</pallas_src>

<mosaic_0001>
module attributes {stable_mosaic.version = 11 : i64} {
  func.func @_stage1_kernel(%arg0: i32, %arg1: memref<32x32xf32, #tpu.memory_space<vmem>>, %arg2: memref<32x264xf32, #tpu.memory_space<vmem>>, %arg3: memref<1x264xf32, #tpu.memory_space<vmem>>, %arg4: memref<32x256xf32, #tpu.memory_space<vmem>>, %arg5: memref<32x8xf32, #tpu.memory_space<vmem>>) attributes {dimension_semantics = [#tpu.dimension_semantics<parallel>], iteration_bounds = array<i64: 1>, scalar_prefetch = 0 : i64, scratch_operands = 0 : i64, tpu.core_type = #tpu.core_type<tc>, window_params = [{transform_indices = @transform_0, window_bounds = array<i64: 32, 32>}, {pipeline_mode = #tpu.pipeline_mode<synchronous>, transform_indices = @transform_1, window_bounds = array<i64: 32, 264>}, {pipeline_mode = #tpu.pipeline_mode<synchronous>, transform_indices = @transform_2, window_bounds = array<i64: 1, 264>}, {transform_indices = @transform_3, window_bounds = array<i64: 32, 256>}, {transform_indices = @transform_4, window_bounds = array<i64: 32, 8>}]} {
    %c0 = arith.constant 0 : index
    %c0_0 = arith.constant 0 : index
    %0 = vector.load %arg1[%c0, %c0_0] : memref<32x32xf32, #tpu.memory_space<vmem>>, vector<32x32xf32>
    %c0_1 = arith.constant 0 : index
    %c0_2 = arith.constant 0 : index
    %1 = vector.load %arg2[%c0_1, %c0_2] : memref<32x264xf32, #tpu.memory_space<vmem>>, vector<32x264xf32>
    %cst = arith.constant dense<0.000000e+00> : vector<32x264xf32>
    %2 = tpu.matmul %0, %1, %cst {dimension_numbers = #tpu.dot_dimension_numbers<[1], [0], [0], [1], [0, 0, 1, 1], [], []>} : vector<32x32xf32>, vector<32x264xf32>, vector<32x264xf32> -> vector<32x264xf32>
    %c0_3 = arith.constant 0 : index
    %c0_4 = arith.constant 0 : index
    %3 = vector.load %arg3[%c0_3, %c0_4] : memref<1x264xf32, #tpu.memory_space<vmem>>, vector<1x264xf32>
    %4 = vector.broadcast %3 : vector<1x264xf32> to vector<32x264xf32>
    %5 = arith.addf %2, %4 : vector<32x264xf32>
    %6 = vector.extract_strided_slice %5 {offsets = [0, 0], sizes = [32, 256], strides = [1, 1]} : vector<32x264xf32> to vector<32x256xf32>
    %c0_5 = arith.constant 0 : index
    %c0_6 = arith.constant 0 : index
    %7 = vector.load %arg4[%c0_5, %c0_6] : memref<32x256xf32, #tpu.memory_space<vmem>>, vector<32x256xf32>
    tpu.vector_store %arg4[%c0_5, %c0_6], %6 {strides = array<i32>} : memref<32x256xf32, #tpu.memory_space<vmem>>, vector<32x256xf32>,
    %8 = vector.extract_strided_slice %5 {offsets = [0, 256], sizes = [32, 8], strides = [1, 1]} : vector<32x264xf32> to vector<32x8xf32>
    %c0_7 = arith.constant 0 : index
    %c0_8 = arith.constant 0 : index
    %9 = vector.load %arg5[%c0_7, %c0_8] : memref<32x8xf32, #tpu.memory_space<vmem>>, vector<32x8xf32>
    tpu.vector_store %arg5[%c0_7, %c0_8], %8 {strides = array<i32>} : memref<32x8xf32, #tpu.memory_space<vmem>>, vector<32x8xf32>,
    return
  }
  func.func @transform_0(%arg0: i32) -> (i32, i32) {
    %c0_i32 = arith.constant 0 : i32
    %c0_i32_0 = arith.constant 0 : i32
    return %arg0, %c0_i32 : i32, i32
  }
  func.func @transform_1(%arg0: i32) -> (i32, i32) {
    %c0_i32 = arith.constant 0 : i32
    %c0_i32_0 = arith.constant 0 : i32
    %c0_i32_1 = arith.constant 0 : i32
    return %c0_i32, %c0_i32_0 : i32, i32
  }
  func.func @transform_2(%arg0: i32) -> (i32, i32) {
    %c0_i32 = arith.constant 0 : i32
    %c0_i32_0 = arith.constant 0 : i32
    %c0_i32_1 = arith.constant 0 : i32
    return %c0_i32, %c0_i32_0 : i32, i32
  }
  func.func @transform_3(%arg0: i32) -> (i32, i32) {
    %c0_i32 = arith.constant 0 : i32
    %c0_i32_0 = arith.constant 0 : i32
    return %arg0, %c0_i32 : i32, i32
  }
  func.func @transform_4(%arg0: i32) -> (i32, i32) {
    %c0_i32 = arith.constant 0 : i32
    %c0_i32_0 = arith.constant 0 : i32
    return %arg0, %c0_i32 : i32, i32
  }
}

module attributes {stable_mosaic.version = 11 : i64} {
  func.func @_stage2_kernel(%arg0: i32, %arg1: memref<1x16x32xf32, #tpu.memory_space<vmem>>, %arg2: memref<1x128x32xf32, #tpu.memory_space<vmem>>, %arg3: memref<1x1x128xf32, #tpu.memory_space<vmem>>, %arg4: memref<1x16x128xf32, #tpu.memory_space<vmem>>) attributes {dimension_semantics = [#tpu.dimension_semantics<parallel>], iteration_bounds = array<i64: 2>, scalar_prefetch = 0 : i64, scratch_operands = 0 : i64, tpu.core_type = #tpu.core_type<tc>, window_params = [{transform_indices = @transform_0, window_bounds = array<i64: 1, 16, 32>}, {transform_indices = @transform_1, window_bounds = array<i64: 1, 128, 32>}, {transform_indices = @transform_2, window_bounds = array<i64: 1, 1, 128>}, {transform_indices = @transform_3, window_bounds = array<i64: 1, 16, 128>}]} {
    %c0 = arith.constant 0 : index
    %c0_0 = arith.constant 0 : index
    %c0_1 = arith.constant 0 : index
    %0 = vector.load %arg1[%c0, %c0_0, %c0_1] : memref<1x16x32xf32, #tpu.memory_space<vmem>>, vector<1x16x32xf32>
    %1 = vector.shape_cast %0 : vector<1x16x32xf32> to vector<16x32xf32>
    %c0_2 = arith.constant 0 : index
    %c0_3 = arith.constant 0 : index
    %c0_4 = arith.constant 0 : index
    %2 = vector.load %arg2[%c0_2, %c0_3, %c0_4] : memref<1x128x32xf32, #tpu.memory_space<vmem>>, vector<1x128x32xf32>
    %3 = vector.shape_cast %2 : vector<1x128x32xf32> to vector<128x32xf32>
    %cst = arith.constant dense<0.000000e+00> : vector<16x128xf32>
    %4 = tpu.matmul %1, %3, %cst {dimension_numbers = #tpu.dot_dimension_numbers<[1], [1], [0], [0], [0, 0, 1, 0], [], []>} : vector<16x32xf32>, vector<128x32xf32>, vector<16x128xf32> -> vector<16x128xf32>
    %c0_5 = arith.constant 0 : index
    %c0_6 = arith.constant 0 : index
    %c0_7 = arith.constant 0 : index
    %5 = vector.load %arg3[%c0_5, %c0_6, %c0_7] : memref<1x1x128xf32, #tpu.memory_space<vmem>>, vector<1x1x128xf32>
    %6 = vector.shape_cast %5 : vector<1x1x128xf32> to vector<1x128xf32>
    %7 = vector.broadcast %6 : vector<1x128xf32> to vector<16x128xf32>
    %8 = arith.addf %4, %7 : vector<16x128xf32>
    %c0_8 = arith.constant 0 : index
    %c0_9 = arith.constant 0 : index
    %c0_10 = arith.constant 0 : index
    %9 = vector.load %arg4[%c0_8, %c0_9, %c0_10] : memref<1x16x128xf32, #tpu.memory_space<vmem>>, vector<1x16x128xf32>
    %10 = vector.shape_cast %9 : vector<1x16x128xf32> to vector<16x128xf32>
    %11 = vector.shape_cast %8 : vector<16x128xf32> to vector<1x16x128xf32>
    tpu.vector_store %arg4[%c0_8, %c0_9, %c0_10], %11 {strides = array<i32>} : memref<1x16x128xf32, #tpu.memory_space<vmem>>, vector<1x16x128xf32>,
    return
  }
  func.func @transform_0(%arg0: i32) -> (i32, i32, i32) {
    %c0_i32 = arith.constant 0 : i32
    %c0_i32_0 = arith.constant 0 : i32
    %c0_i32_1 = arith.constant 0 : i32
    return %arg0, %c0_i32, %c0_i32_0 : i32, i32, i32
  }
  func.func @transform_1(%arg0: i32) -> (i32, i32, i32) {
    %c0_i32 = arith.constant 0 : i32
    %c0_i32_0 = arith.constant 0 : i32
    %c0_i32_1 = arith.constant 0 : i32
    return %arg0, %c0_i32, %c0_i32_0 : i32, i32, i32
  }
  func.func @transform_2(%arg0: i32) -> (i32, i32, i32) {
    %c0_i32 = arith.constant 0 : i32
    %c0_i32_0 = arith.constant 0 : i32
    %c0_i32_1 = arith.constant 0 : i32
    return %arg0, %c0_i32, %c0_i32_0 : i32, i32, i32
  }
  func.func @transform_3(%arg0: i32) -> (i32, i32, i32) {
    %c0_i32 = arith.constant 0 : i32
    %c0_i32_0 = arith.constant 0 : i32
    %c0_i32_1 = arith.constant 0 : i32
    return %arg0, %c0_i32, %c0_i32_0 : i32, i32, i32
  }
}

</mosaic_0001>

<bundles_post_ra>
// kernel: biaffine_forward.2
= control target key start
LH: loop header
LB: loop body
LE: loop exit
PB: predicated region body
PF: predicated region fallthrough
CT: control target
= control target key end

     0   :  { %10 = vsyncpa [#allocation3], 0  ;;  %s495_s0 = inlined_call_operand.hbm [shape: f32[32,32], index: 0, kind: input, shape index: {}]   ;;  %s496_s1 = inlined_call_operand.hbm [shape: f32[32,264], index: 1, kind: input, shape index: {}]   ;;  %s497_s2 = inlined_call_operand.vmem [shape: f32[1,264], index: 2, kind: input, shape index: {}]   ;;  %s498_s3 = inlined_call_operand.vmem [shape: f32[32,256], index: 3, kind: output, shape index: {0}]   ;;  %s499_s4 = inlined_call_operand.vmem [shape: f32[32,8], index: 4, kind: output, shape index: {1}]  }
   0x1   :  { %11 = vsyncpa [#allocation5], 0  ;;  %s388_s15 = smov [#allocation2]   ;;  %s340_s19 = scalar_lea.hbm %s495_s0, 512 }
   0x2   :  { %s17_s16 = sshll.u32 %s388_s15, 4  ;;  %p341_p0 = scmp.ne.s32.totalorder %s495_s0, %s340_s19  ;;  %s18_s16 = int_to_ptr.vmem [resolvable:$true] %s17_s16 }
   0x3   :  { %p344_p1 = scmp.lt.u32.totalorder %s340_s19, %s495_s0 }
   0x5   :  { %p346_p2 = pnand %p344_p1, %p341_p0 }
   0x7   :  { %349 = shalt.err (!%p346_p2)
}
   0x8   :  { %s350_s24 = scalar_lea.vmem %s18_s16, 512  ;;  %p355_p4 = scmp.lt.s32.totalorder %s18_s16, %s18_s16 }
   0x9   :  { %p351_p3 = scmp.ne.s32.totalorder %s18_s16, %s350_s24  ;;  %p356_p5 = scmp.lt.s32.totalorder %s350_s24, %s350_s24 }
   0xb   :  { %p357_p6 = por %p356_p5, %p355_p4 }
   0xd   :  { %p358_p7 = pnand %p357_p6, %p351_p3 }
   0xf   :  { %361 = shalt.err (!%p358_p7)
}
  0x10   :  { %s389_s25 = smov 128   ;;  %s390_s26 = smov 8  }
  0x11   :  { %23 = dma.hbm_to_vmem [thread:$0]  %s495_s0, 512, %s18_s16, [#allocation3], %s389_s25, %s389_s25, %s390_s26  }
  0x12   :  { %s391_s29 = smov [#allocation4]   ;;  %s362_s7 = scalar_lea.hbm %s496_s1, 1536 }
  0x13   :  { %s29_s30 = sshll.u32 %s391_s29, 4  ;;  %p363_p8 = scmp.ne.s32.totalorder %s496_s1, %s362_s7  ;;  %s30_s30 = int_to_ptr.vmem [resolvable:$true] %s29_s30 }
  0x14   :  { %p366_p9 = scmp.lt.u32.totalorder %s362_s7, %s496_s1 }
  0x16   :  { %p368_p10 = pnand %p366_p9, %p363_p8 }
  0x18   :  { %371 = shalt.err (!%p368_p10)
}
  0x19   :  { %s372_s12 = scalar_lea.vmem %s30_s30, 1536  ;;  %p377_p12 = scmp.lt.s32.totalorder %s30_s30, %s30_s30 }
  0x1a   :  { %p373_p11 = scmp.ne.s32.totalorder %s30_s30, %s372_s12  ;;  %p378_p13 = scmp.lt.s32.totalorder %s372_s12, %s372_s12 }
  0x1c   :  { %p379_p0 = por %p378_p13, %p377_p12 }
  0x1e   :  { %p380_p1 = pnand %p379_p0, %p373_p11 }
  0x20   :  { %383 = shalt.err (!%p380_p1)
}
  0x21   :  { %s392_s0 = smov 384   ;;  %s393_s13 = smov 24  }
  0x22   :  { %35 = dma.hbm_to_vmem [thread:$0]  %s496_s1, 1536, %s30_s30, [#allocation5], %s392_s0, %s392_s0, %s393_s13  }
  0x23   :  { %384 = dma.done.wait [#allocation3], 512  }
  0x24   :  { %385 = vsyncadd [#allocation3], 4294966784 }
  0x25   :  { %386 = dma.done.wait [#allocation5], 1536  }
  0x26   :  { %387 = vsyncadd [#allocation5], 4294965760  ;;  %v394_v0 = vmov 0.0   ;;  %v49_v1 = vld [vmem:[#allocation4 + $0x8] sm:$0xff]  ;;  %v52_v2 = vld [vmem:[#allocation4 + $0x20] sm:$0xff]  ;;  %vm77_vm0 = vcmask 261120   ;;  %v62_v23 = vlaneseq }
  0x27   :  { %154 = vmatprep.mubr.f32.mxu0 %v394_v0  ;;  %v48_v3 = vld [vmem:[#allocation4] sm:$0xff]  ;;  %v317_v4 = vpack.c.bf16 %v52_v2, %v49_v1  ;;  %v51_v5 = vld [vmem:[#allocation4 + $0x18] sm:$0xff]  ;;  %v58_v7 = vld [vmem:[#allocation4 + $0x50] sm:$0xff]  ;;  %vm272_vm1 = vcmask 64512  }
  0x28   :  { %v55_v6 = vld [vmem:[#allocation4 + $0x38] sm:$0xff]  ;;  %v319_v8 = vpack.c.bf16 %v51_v5, %v48_v3  ;;  %v54_v10 = vld [vmem:[#allocation4 + $0x30] sm:$0xff]  ;;  %v57_v11 = vld [vmem:[#allocation4 + $0x48] sm:$0xff]  ;;  %v63_v24 = vshrl.u32 %v62_v23, 7 }
  0x29   :  { %v321_v9 = vpack.c.bf16 %v58_v7, %v55_v6  ;;  %v50_v12 = vld [vmem:[#allocation4 + $0x10] sm:$0xff]  ;;  %318 = vmatprep.subr.bf16.mxu0 %v317_v4  ;;  %v53_v13 = vld [vmem:[#allocation4 + $0x28] sm:$0xff]  ;;  %v44_v14 = vld [vmem:[#allocation2] sm:$0xff]  ;;  %v323_v16 = vpack.c.bf16 %v57_v11, %v54_v10 }
  0x2a   :  { %v56_v15 = vld [vmem:[#allocation4 + $0x40] sm:$0xff]  ;;  %320 = vmatpush1.bf16.msra.mxu0 %v319_v8  ;;  %v325_v17 = vpack.c.bf16 %v53_v13, %v50_v12  ;;  %v59_v18 = vld [vmem:[#allocation4 + $0x58] sm:$0xff]  ;;  %311 = vmatprep.mubr.msk.f32.mxu1 %vm77_vm0, %v44_v14  ;;  %v45_v20 = vld [vmem:[#allocation2 + $0x8] sm:$0xff]  ;;  %v64_v25 = vsub.s32 0, %v63_v24  ;;  %v68_v27 = vsub.s32 1, %v63_v24  ;;  %v72_v28 = vsub.s32 2, %v63_v24 }
  0x2b   :  { %322 = vmatprep.subr.bf16.mxu0 %v321_v9  ;;  %v329_v19 = vpack.c.bf16 %v59_v18, %v56_v15  ;;  %v46_v21 = vld [vmem:[#allocation2 + $0x10] sm:$0xff]  ;;  %v47_v22 = vld [vmem:[#allocation2 + $0x18] sm:$0xff]  ;;  %v60_v26 = vld [vmem:[%s497_s2] sm:$0x7] }
  0x2c   :  { %326 = vmatprep.subr.bf16.mxu1 %v325_v17  ;;  %v65_v29 = vrot.slane %v60_v26, %v64_v25  ;;  %v69_v30 = vrot.slane %v60_v26, %v68_v27  ;;  %v73_v32 = vrot.slane %v60_v26, %v72_v28 }
  0x2d   :  { %328 = vmatpush3.bf16.msra.mxu1 %v325_v17 }
  0x2e   :  { %324 = vmatpush1.bf16.msra.mxu0 %v323_v16  ;;  %330 = vmatprep.subr.bf16.mxu1 %v329_v19 }
  0x31   :  { %287 = vmatmul.mubr.msk.f32.vlgmr.msra.gmra.mrb[0].mxu0 %vm77_vm0, %v44_v14  ;;  %332 = vmatpush3.bf16.msra.mxu1 %v329_v19 }
  0x32   :  { %160 = vmatprep.mubr.f32.mxu0 %v394_v0 }
  0x34   :  { %312 = vmatmul.mubr.msk.f32.vlgmr.msra.gmra.mrb[0].mxu1 %vm77_vm0, %v45_v20 }
  0x35   :  { %288 = vmatmul.mubr.msk.f32.gmra.mrb[2].mxu0 %vm77_vm0, %v45_v20  ;;  %314 = vmatprep.mubr.msk.f32.mxu1 %vm77_vm0, %v46_v21 }
  0x36   :  { %166 = vmatprep.mubr.f32.mxu0 %v394_v0 }
  0x38   :  { %315 = vmatmul.mubr.msk.f32.gmra.mrb[2].mxu1 %vm77_vm0, %v47_v22 }
  0x39   :  { %289 = vmatmul.mubr.msk.f32.gmra.mrb[4].mxu0 %vm77_vm0, %v46_v21 }
  0x3a   :  { %172 = vmatprep.mubr.f32.mxu0 %v394_v0 }
  0x3d   :  { %290 = vmatmul.mubr.msk.f32.gmra.mrb[6].mxu0 %vm77_vm0, %v47_v22 }
 0x104   :  { %v156_v31 = vpop.f32.mrb[0].mxu0 }
 0x105   :  { %v157_v33 = vadd.f32 %v156_v31, %v65_v29  ;;  %v158_v34 = vpop.f32.mrb[1].mxu0 }
 0x106   :  { %v159_v35 = vadd.f32 %v158_v34, %v69_v30 }
 0x107   :  { %264 = vst [vmem:[%s498_s3] sm:$0xff] %v157_v33  ;;  %v313_v36 = vpop.f32.mrb[0].mxu1 }
 0x108   :  { %265 = vst [vmem:[%s498_s3 + $0x8] sm:$0xff] %v159_v35  ;;  %v162_v37 = vpop.f32.mrb[2].mxu0  ;;  %v251_v38 = vadd.f32 %v313_v36, %v73_v32  ;;  %v245_v39 = vpop.f32.mrb[1].mxu1 }
 0x109   :  { %v163_v40 = vadd.f32 %v162_v37, %v65_v29  ;;  %v164_v41 = vpop.f32.mrb[3].mxu0  ;;  %v246_v42 = vadd.f32 %v245_v39, %v73_v32 }
 0x10a   :  { %v165_v43 = vadd.f32 %v164_v41, %v69_v30  ;;  %274 = vst.msk [vmem:[%s499_s4 + $0x8] sm:$0xff] %vm272_vm1, %v251_v38 }
 0x10b   :  { %266 = vst [vmem:[%s498_s3 + $0x10] sm:$0xff] %v163_v40  ;;  %273 = vst.msk [vmem:[%s499_s4] sm:$0xff] %vm272_vm1, %v246_v42  ;;  %v316_v44 = vpop.f32.mrb[2].mxu1 }
 0x10c   :  { %267 = vst [vmem:[%s498_s3 + $0x18] sm:$0xff] %v165_v43  ;;  %v168_v45 = vpop.f32.mrb[4].mxu0  ;;  %v261_v46 = vadd.f32 %v316_v44, %v73_v32  ;;  %v255_v47 = vpop.f32.mrb[3].mxu1 }
 0x10d   :  { %v169_v48 = vadd.f32 %v168_v45, %v65_v29  ;;  %v170_v49 = vpop.f32.mrb[5].mxu0  ;;  %v256_v50 = vadd.f32 %v255_v47, %v73_v32 }
 0x10e   :  { %v171_v51 = vadd.f32 %v170_v49, %v69_v30  ;;  %276 = vst.msk [vmem:[%s499_s4 + $0x18] sm:$0xff] %vm272_vm1, %v261_v46 }
 0x10f   :  { %268 = vst [vmem:[%s498_s3 + $0x20] sm:$0xff] %v169_v48  ;;  %275 = vst.msk [vmem:[%s499_s4 + $0x10] sm:$0xff] %vm272_vm1, %v256_v50 }
 0x110   :  { %269 = vst [vmem:[%s498_s3 + $0x28] sm:$0xff] %v171_v51  ;;  %v174_v52 = vpop.f32.mrb[6].mxu0 }
 0x111   :  { %v175_v53 = vadd.f32 %v174_v52, %v65_v29  ;;  %v176_v54 = vpop.f32.mrb[7].mxu0 }
 0x112   :  { %v177_v55 = vadd.f32 %v176_v54, %v69_v30 }
 0x113   :  { %270 = vst [vmem:[%s498_s3 + $0x30] sm:$0xff] %v175_v53 }
 0x114   :  { %271 = vst [vmem:[%s498_s3 + $0x38] sm:$0xff] %v177_v55 }
 0x115   :  { %285 = vsyncpa [#allocation3], 1 }
 0x116   :  { %286 = vsyncpa [#allocation5], 1 }

// kernel: biaffine_forward.3
= control target key start
LH: loop header
LB: loop body
LE: loop exit
PB: predicated region body
PF: predicated region fallthrough
CT: control target
= control target key end

     0   :  { %8 = vsyncpa [#allocation3], 0  ;;  %s898_s0 = inlined_call_operand.vmem [shape: f32[2,16,32], index: 0, kind: input, shape index: {}]   ;;  %s899_s1 = inlined_call_operand.vmem [shape: f32[2,128,32], index: 1, kind: input, shape index: {}]   ;;  %s900_s2 = inlined_call_operand.vmem [shape: f32[2,1,128], index: 2, kind: input, shape index: {}]   ;;  %s901_s3 = inlined_call_operand.hbm [shape: f32[2,16,128], index: 3, kind: output, shape index: {}]  }
   0x1   :  { %10 = vsyncpa [#allocation3 + $0x1], 0  ;;  %s722_s12 = smov 0   ;;  %s724_s13 = smov 0  }
   0x2   :  { %s726_s14 = smov 0   ;;  %s728_s15 = smov 0  }
   0x3 LB: > { %s743_s16 = sadd.s32 4294967295, %s697_s15   ;;  %s457_s17 = sadd.s32 4294967294, %s697_s15   ;;  %s697_s15 = sphi %s728_s15, %s909_s15   ;;  %s693_s14 = sphi %s726_s14, %s908_s14   ;;  %s689_s13 = sphi %s724_s13, %s907_s13   ;;  %s685_s12 = sphi %s722_s12, %s906_s12  }
   0x4   : > { %s747_s18 = sadd.s32 1, %s697_s15   ;;  %s101_s19 = sadd.s32 1, %s693_s14 }
   0x5   : > { %s98_s20 = ssub.s32 %s697_s15, %s747_s18  ;;  %p111_p0 = scmp.ne.s32.totalorder %s693_s14, %s689_s13 }
   0x6   : > { %p99_p1 = scmp.eq.s32.totalorder %s98_s20, 0  ;;  %p112_p2 = scmp.eq.s32.totalorder %s743_s16, 1 }
   0x7   : > { %p117_p3 = scmp.ne.s32.totalorder %s689_s13, %s685_s12  ;;  %p118_p4 = scmp.eq.s32.totalorder %s457_s17, 1 }
   0x8   : > { %s758_s21 = scalar_select %p99_p1, %s693_s14, %s101_s19  }
   0x9   : > { %p760_p5 = por %p112_p2, %p111_p0  ;;  %p764_p6 = por %p118_p4, %p117_p3 }
   0xa   : > { %p460_p7 = scmp.ge.s32.totalorder %s697_s15, 1  ;;  %p158_p8 = scmp.lt.s32.totalorder %s697_s15, 3 }
   0xc   : > { %p159_p9 = pnand %p460_p7, %p158_p8 }
   0xd   : > { %p190_p10 = scmp.lt.s32.totalorder (!%p159_p9), %s743_s16, 1  ;;  %vm228_vm0 = vcmask (!%p159_p9), 261120   ;;  %s187_s6 = sand.u32 (!%p159_p9), 1, %s689_s13  }
   0xe   : > { %162 = sbr.rel (%p159_p9) target bundleno = 322 (0x142), region = 32  ;;  %vm782_vm1 = vmpackc.low (!%p159_p9), %vm228_vm0, %vm228_vm0  ;;  %s461_s7 = sshll.u32 (!%p159_p9), %s187_s6, 4 }
   0xf   : > { %s189_s11 = scalar_lea.vmem (!%p159_p9), [#allocation2], %s461_s7  ;;  %s492_s19 = sshll.u32 (!%p159_p9), %s743_s16, 8 }
  0x10   : > { %s374_s17 = sshll.u32 (!%p159_p9), %s189_s11, 4  ;;  %s855_s26 = scalar_lea.hbm (!%p159_p9), %s901_s3, %s492_s19  ;;  %s850_s17 = int_to_ptr.vmem [resolvable:$true] %s374_s17 }
  0x11   : > { %s635_s27 = scalar_lea.vmem (!%p159_p9), %s850_s17, 256 }
  0x12   : > { %p636_p11 = scmp.ne.s32.totalorder (!%p159_p9), %s850_s17, %s635_s27 }
  0x14   : > { %p637_p12 = pnand (!%p159_p9), %p636_p11, %p760_p5 }
  0x15   : > { %s772_s24 = scalar_select %p190_p10, %s743_s16, 1 }
  0x16   : > { %p638_p13 = pneg %p637_p12  ;;  %s699_s16 = smov [#allocation2]  }
  0x17   : > { %s491_s25 = sshll.u32 %s772_s24, 7  ;;  %s490_s29 = sshll.u32 %s772_s24, 4 }
  0x18   : > { %s778_s28 = scalar_lea.vmem %s899_s1, %s491_s25  ;;  %s794_s5 = scalar_lea.vmem %s898_s0, %s490_s29 }
  0x19   : > { %v205_v1 = vld [vmem:[%s778_s28] sm:$0xff]  ;;  %v206_v2 = vld [vmem:[%s778_s28 + $0x8] sm:$0xff]  ;;  %v207_v3 = vld [vmem:[%s778_s28 + $0x10] sm:$0xff]  ;;  %s202_s10 = scalar_lea.vmem %s900_s2, %s772_s24  ;;  %s857_s24 = scalar_lea.sflag [#allocation3], %s187_s6 }
  0x1a   : > { %v546_v4 = vpack.c.bf16 %v206_v2, %v205_v1  ;;  %v208_v5 = vld [vmem:[%s778_s28 + $0x18] sm:$0xff]  ;;  %v203_v7 = vld [vmem:[%s794_s5] sm:$0xff]  ;;  %v210_v9 = vld [vmem:[%s778_s28 + $0x28] sm:$0xff] }
  0x1b   : > { %v552_v6 = vpack.c.bf16 %v208_v5, %v207_v3  ;;  %v209_v8 = vld [vmem:[%s778_s28 + $0x20] sm:$0xff]  ;;  %543 = vmatprep.mubr.msk.f32.mxu0 %vm228_vm0, %v203_v7  ;;  %v211_v11 = vld [vmem:[%s778_s28 + $0x30] sm:$0xff]  ;;  %v212_v12 = vld [vmem:[%s778_s28 + $0x38] sm:$0xff] }
  0x1c   : > { %548 = vmatprep.subr.msk.bf16.mxu0 %vm782_vm1, %v546_v4  ;;  %v558_v10 = vpack.c.bf16 %v210_v9, %v209_v8  ;;  %v564_v13 = vpack.c.bf16 %v212_v12, %v211_v11  ;;  %v213_v14 = vld [vmem:[%s778_s28 + $0x40] sm:$0xff]  ;;  %v214_v15 = vld [vmem:[%s778_s28 + $0x48] sm:$0xff]  ;;  %v215_v17 = vld [vmem:[%s778_s28 + $0x50] sm:$0xff] }
  0x1d   : > { %551 = vmatpush3.bf16.xpose.msk.msra.mxu0 %vm782_vm1, %v546_v4  ;;  %v570_v16 = vpack.c.bf16 %v214_v15, %v213_v14  ;;  %v216_v18 = vld [vmem:[%s778_s28 + $0x58] sm:$0xff]  ;;  %v217_v20 = vld [vmem:[%s778_s28 + $0x60] sm:$0xff]  ;;  %v218_v21 = vld [vmem:[%s778_s28 + $0x68] sm:$0xff] }
  0x1e   : > { %554 = vmatprep.subr.msk.bf16.mxu0 %vm782_vm1, %v552_v6  ;;  %v576_v19 = vpack.c.bf16 %v216_v18, %v215_v17  ;;  %v582_v22 = vpack.c.bf16 %v218_v21, %v217_v20  ;;  %v219_v23 = vld [vmem:[%s778_s28 + $0x70] sm:$0xff]  ;;  %v220_v24 = vld [vmem:[%s778_s28 + $0x78] sm:$0xff]  ;;  %v204_v26 = vld [vmem:[%s794_s5 + $0x8] sm:$0xff]  ;;  %s639_s28 = sshll.u32 %s699_s16, 4  ;;  %s640_s28 = int_to_ptr.vmem [resolvable:$false] %s639_s28 }
  0x1f   : > { %v588_v25 = vpack.c.bf16 %v220_v24, %v219_v23  ;;  %v466_v27 = vld [vmem:[%s202_s10] ss:$0 sm:$0xff]  ;;  %s641_s29 = scalar_lea.vmem %s640_s28, 512  ;;  %p642_p0 = scmp.lt.s32.totalorder %s850_s17, %s640_s28 }
  0x20   : > { %p643_p1 = scmp.lt.s32.totalorder %s641_s29, %s635_s27 }
  0x22   : > { %p644_p2 = por %p643_p1, %p642_p0 }
  0x24   : > { %p645_p3 = pnand %p644_p2, %p638_p13 }
  0x25   : > { %557 = vmatpush3.bf16.xpose.msk.msra.mxu0 %vm782_vm1, %v552_v6 }
  0x26   : > { %560 = vmatprep.subr.msk.bf16.mxu0 %vm782_vm1, %v558_v10 }
  0x2d   : > { %563 = vmatpush3.bf16.xpose.msk.msra.mxu0 %vm782_vm1, %v558_v10 }
  0x2e   : > { %566 = vmatprep.subr.msk.bf16.mxu0 %vm782_vm1, %v564_v13 }
  0x35   : > { %569 = vmatpush3.bf16.xpose.msk.msra.mxu0 %vm782_vm1, %v564_v13 }
  0x36   : > { %572 = vmatprep.subr.msk.bf16.mxu0 %vm782_vm1, %v570_v16 }
  0x3d   : > { %575 = vmatpush3.bf16.xpose.msk.msra.mxu0 %vm782_vm1, %v570_v16 }
  0x3e   : > { %578 = vmatprep.subr.msk.bf16.mxu0 %vm782_vm1, %v576_v19 }
  0x45   : > { %581 = vmatpush3.bf16.xpose.msk.msra.mxu0 %vm782_vm1, %v576_v19 }
  0x46   : > { %584 = vmatprep.subr.msk.bf16.mxu0 %vm782_vm1, %v582_v22 }
  0x4d   : > { %587 = vmatpush3.bf16.xpose.msk.msra.mxu0 %vm782_vm1, %v582_v22 }
  0x4e   : > { %590 = vmatprep.subr.msk.bf16.mxu0 %vm782_vm1, %v588_v25 }
  0x55   : > { %593 = vmatpush3.bf16.xpose.msk.msra.mxu0 %vm782_vm1, %v588_v25 }
  0x5c   : > { %544 = vmatmul.mubr.msk.f32.vlgmr.msra.gmra.mrb[0].mxu0 %vm228_vm0, %v204_v26 }
 0x12f   : > { %v545_v28 = vpop.f32.mrb[0].mxu0 }
 0x130   : > { %v355_v29 = vadd.f32 %v545_v28, %v466_v27  ;;  %v349_v30 = vpop.f32.mrb[1].mxu0 }
 0x131   : > { %v350_v31 = vadd.f32 %v466_v27, %v349_v30 }
 0x132   : > { %359 = vst [vmem:[%s189_s11 + $0x8] sm:$0xff] %v355_v29 }
 0x133   : > { %358 = vst [vmem:[%s189_s11] sm:$0xff] %v350_v31 }
 0x134   : > { %648 = shalt.err (!%p645_p3)
}
 0x135   : > { %s649_s30 = scalar_lea.hbm %s855_s26, 256  ;;  %s653_s6 = scalar_lea.hbm %s901_s3, 512 }
 0x136   : > { %p650_p4 = scmp.ne.s32.totalorder %s855_s26, %s649_s30  ;;  %p654_p9 = scmp.lt.u32.totalorder %s855_s26, %s901_s3 }
 0x137   : > { %p655_p10 = scmp.lt.u32.totalorder %s653_s6, %s649_s30  ;;  %p657_p12 = scmp.lt.u32.totalorder %s649_s30, %s855_s26 }
 0x138   : > { %p651_p7 = pnand %p650_p4, %p760_p5 }
 0x139   : > { %p656_p11 = por %p655_p10, %p654_p9 }
 0x13a   : > { %p652_p8 = pneg %p651_p7 }
 0x13b   : > { %p658_p13 = por %p657_p12, %p656_p11 }
 0x13d   : > { %p659_p0 = pnand %p658_p13, %p652_p8 }
 0x13f   : > { %662 = shalt.err (!%p659_p0)
}
 0x140   : > { %s700_s9 = smov 128   ;;  %s701_s10 = smov 8  }
 0x141   : > { %594 = dma.vmem_to_hbm [thread:$0]  (%p760_p5), %s850_s17, 256, %s855_s26, %s857_s24, %s700_s9, %s700_s9, %s701_s10  }
 0x142 PF: > { %p600_p1 = scmp.ge.s32.totalorder %s697_s15, 2  ;;  %s389_s11 = sand.u32 1, %s685_s12  }
 0x143   : > { %s390_s19 = scalar_lea.sflag [#allocation3], %s389_s11 }
 0x144   : > { %p597_p2 = pnand %p600_p1, %p764_p6 }
 0x146   : > { %680 = dma.done.wait (!%p597_p2), %s390_s19, 256  }
 0x147   : > { %682 = vsyncadd (!%p597_p2), %s390_s19, 4294967040  ;;  %p13_p3 = scmp.ge.s32.totalorder %s747_s18, 4   ;;  %s906_s12 = smov %s689_s13 }
 0x148   : > { %s907_s13 = smov %s693_s14  ;;  %s908_s14 = smov %s758_s21 }
 0x149   : > { %s909_s15 = smov %s747_s18  ;;  %15 = sbr.rel (!%p13_p3) target bundleno = 3 (0x3), region = 73 }
 0x150   :  { %395 = vsyncpa [#allocation3], 1 }
 0x151   :  { %397 = vsyncpa [#allocation3 + $0x1], 1 }

</bundles_post_ra>
